<compile_context>
chip_gen: v7x
topology: tpu7x:2x2x1
jax: 0.10.0
libtpu: 0.0.40
codegen_flags: <defaults>
</compile_context>

<pallas_src>
import functools

import jax
import jax.numpy as jnp
from jax.experimental import pallas as pl
from jax.experimental.pallas import tpu as pltpu


def _round_up(x, m):
    return ((x + m - 1) // m) * m


def _pad2(x, rows, cols):
    r, c = x.shape
    return jnp.pad(x, ((0, rows - r), (0, cols - c)))


def _conv_kernel(a_ref, xb_ref, xs_ref, w1_ref, b1_ref, w2_ref, b2_ref,
                 out_ref, *, c_valid, final):
    """One GINConv (+ optional trailing ReLU or log_softmax) on a row block.

    a_ref : [TM, N_pad]     bf16  adjacency row block (counts of j->i edges)
    xb_ref: [N_pad, C_in]   bf16  full node features (aggregation operand)
    xs_ref: [TM, C_in]      f32   this block's own node features (self term)
    w*,b* : f32 padded MLP weights / biases
    """
    # ---- aggregation: A @ X (bf16 operands, f32 accumulate on the MXU) ----
    agg = jnp.dot(a_ref[...], xb_ref[...], preferred_element_type=jnp.float32)
    h = agg + xs_ref[...]                       # (1 + eps) * x with eps = 0

    # ---- 2-layer MLP (f32) ----
    z = jnp.dot(h, w1_ref[...], preferred_element_type=jnp.float32) + b1_ref[...]
    z = jnp.maximum(z, 0.0)                     # MLP inner ReLU
    z2 = jnp.dot(z, w2_ref[...], preferred_element_type=jnp.float32) + b2_ref[...]

    if final:
        # ---- log_softmax over the first `c_valid` (real) channels ----
        mask = jax.lax.broadcasted_iota(jnp.int32, z2.shape, 1) < c_valid
        logits = jnp.where(mask, z2, jnp.float32(-1e30))
        m = jnp.max(logits, axis=1, keepdims=True)
        s = logits - m
        e = jnp.where(mask, jnp.exp(s), 0.0)
        lse = jnp.log(jnp.sum(e, axis=1, keepdims=True))
        out_ref[...] = s - lse
    else:
        out_ref[...] = jnp.maximum(z2, 0.0)     # F.relu after conv1


def _gin_conv(adj_bf16, x_f32, w1, b1, w2, b2, tm, *, final, c_valid):
    n_pad = adj_bf16.shape[0]
    c_in = x_f32.shape[1]
    h_mid = w1.shape[1]
    c_out = w2.shape[1]
    grid = (n_pad // tm,)

    kernel = functools.partial(_conv_kernel, c_valid=c_valid, final=final)

    flops = 2 * n_pad * n_pad * c_in + 2 * n_pad * c_in * h_mid + 2 * n_pad * h_mid * c_out
    bytes_accessed = (n_pad * n_pad * 2            # A (bf16)
                      + n_pad * c_in * (2 + 4)     # X bf16 + X f32
                      + (c_in * h_mid + h_mid + h_mid * c_out + c_out) * 4
                      + n_pad * c_out * 4)         # output
    transcendentals = n_pad * c_out if final else 0

    return pl.pallas_call(
        kernel,
        out_shape=jax.ShapeDtypeStruct((n_pad, c_out), jnp.float32),
        grid=grid,
        in_specs=[
            pl.BlockSpec((tm, n_pad), lambda i: (i, 0)),     # A row block (pipelined)
            pl.BlockSpec((n_pad, c_in), lambda i: (0, 0)),   # X full, resident (bf16)
            pl.BlockSpec((tm, c_in), lambda i: (i, 0)),      # X row block (f32, self term)
            pl.BlockSpec((c_in, h_mid), lambda i: (0, 0)),   # W1
            pl.BlockSpec((1, h_mid), lambda i: (0, 0)),      # b1
            pl.BlockSpec((h_mid, c_out), lambda i: (0, 0)),  # W2
            pl.BlockSpec((1, c_out), lambda i: (0, 0)),      # b2
        ],
        out_specs=pl.BlockSpec((tm, c_out), lambda i: (i, 0)),
        compiler_params=pltpu.CompilerParams(
            dimension_semantics=("parallel",)),              # v7x: split rows across TCs
        cost_estimate=pl.CostEstimate(flops=flops,
                                      transcendentals=transcendentals,
                                      bytes_accessed=bytes_accessed),
    )(adj_bf16, x_f32.astype(jnp.bfloat16), x_f32, w1, b1, w2, b2)


def gin_forward(x, edge_index, params):
    """x: [N, C_in] float32, edge_index: [2, E] int32 (row 0 = src, row 1 = dst)."""
    n, c_in = x.shape
    hidden = params["w1"].shape[1]
    c_out = params["w4"].shape[1]

    LANE = 128
    TM = 256                                   # 256-aligned for v6e/v7x MXU, /128 for v5e
    n_pad = max(_round_up(n, TM), TM)
    c_in_pad = _round_up(max(c_in, LANE), LANE)
    h_pad = _round_up(max(hidden, LANE), LANE)
    c_out_pad = _round_up(max(c_out, LANE), LANE)

    # Glue: dense adjacency A[i, j] = #edges j -> i (scatter-add), stored bf16.
    # (bf16 counts are exact up to 256 parallel edges per node pair.)
    src, dst = edge_index[0], edge_index[1]
    adj = (jnp.zeros((n_pad, n_pad), jnp.float32)
           .at[dst, src].add(1.0)
           .astype(jnp.bfloat16))

    x_pad = _pad2(x.astype(jnp.float32), n_pad, c_in_pad)

    # Pad weights / biases to lane-dense 128-wide slabs (zero padding is inert).
    w1 = _pad2(params["w1"], c_in_pad, h_pad)
    b1 = _pad2(params["b1"], 1, h_pad)
    w2 = _pad2(params["w2"], h_pad, h_pad)
    b2 = _pad2(params["b2"], 1, h_pad)
    w3 = _pad2(params["w3"], h_pad, h_pad)
    b3 = _pad2(params["b3"], 1, h_pad)
    w4 = _pad2(params["w4"], h_pad, c_out_pad)
    b4 = _pad2(params["b4"], 1, c_out_pad)

    # conv1 + ReLU
    x1 = _gin_conv(adj, x_pad, w1, b1, w2, b2, TM, final=False, c_valid=h_pad)

    # Dropout(0.5): identity in eval/inference mode.
    # TODO(synk): training-mode dropout (random mask + 1/keep_prob scaling) not implemented.

    # conv2 + log_softmax (masked to the real out_channels)
    out_pad = _gin_conv(adj, x1, w3, b3, w4, b4, TM, final=True, c_valid=c_out)

    return out_pad[:n, :c_out]


def init_params(key, in_channels, out_channels, hidden=64):
    """Deterministic init; weights stored as [in, out] (pre-transposed vs torch)."""
    ks = jax.random.split(key, 8)

    def lin(kw, kb, fan_in, fan_out):
        bound = 1.0 / jnp.sqrt(fan_in)
        w = jax.random.uniform(kw, (fan_in, fan_out), jnp.float32, -bound, bound)
        b = jax.random.uniform(kb, (1, fan_out), jnp.float32, -bound, bound)
        return w, b

    w1, b1 = lin(ks[0], ks[1], in_channels, hidden)
    w2, b2 = lin(ks[2], ks[3], hidden, hidden)
    w3, b3 = lin(ks[4], ks[5], hidden, hidden)
    w4, b4 = lin(ks[6], ks[7], hidden, out_channels)
    return dict(w1=w1, b1=b1, w2=w2, b2=b2, w3=w3, b3=b3, w4=w4, b4=b4)


if __name__ == "__main__":
    key = jax.random.PRNGKey(0)
    k_x, k_e, k_p = jax.random.split(key, 3)

    N, IN_CH, OUT_CH, E = 32, 16, 8, 64

    x = jax.random.normal(k_x, (N, IN_CH), jnp.float32)
    edge_index = jax.random.randint(k_e, (2, E), 0, N, jnp.int32)
    params = init_params(k_p, IN_CH, OUT_CH)

    out = gin_forward(x, edge_index, params)
    jax.block_until_ready(out)

    assert out.shape == (N, OUT_CH)
    # log_softmax rows should (approximately) exponentiate-and-sum to 1.
    row_sums = jnp.sum(jnp.exp(out), axis=1)
    assert jnp.allclose(row_sums, jnp.ones((N,), jnp.float32), atol=1e-4)

    print("KERNEL_OK")
</pallas_src>

<mosaic_0001>
module attributes {stable_mosaic.version = 11 : i64} {
  func.func @_conv_kernel(%arg0: i32, %arg1: memref<256x256xbf16, #tpu.memory_space<vmem>>, %arg2: memref<256x128xbf16, #tpu.memory_space<vmem>>, %arg3: memref<256x128xf32, #tpu.memory_space<vmem>>, %arg4: memref<128x128xf32, #tpu.memory_space<vmem>>, %arg5: memref<1x128xf32, #tpu.memory_space<vmem>>, %arg6: memref<128x128xf32, #tpu.memory_space<vmem>>, %arg7: memref<1x128xf32, #tpu.memory_space<vmem>>, %arg8: memref<256x128xf32, #tpu.memory_space<vmem>>) attributes {dimension_semantics = [#tpu.dimension_semantics<parallel>], iteration_bounds = array<i64: 1>, scalar_prefetch = 0 : i64, scratch_operands = 0 : i64, tpu.core_type = #tpu.core_type<tc>, window_params = [{transform_indices = @transform_0, window_bounds = array<i64: 256, 256>}, {pipeline_mode = #tpu.pipeline_mode<synchronous>, transform_indices = @transform_1, window_bounds = array<i64: 256, 128>}, {transform_indices = @transform_2, window_bounds = array<i64: 256, 128>}, {pipeline_mode = #tpu.pipeline_mode<synchronous>, transform_indices = @transform_3, window_bounds = array<i64: 128, 128>}, {pipeline_mode = #tpu.pipeline_mode<synchronous>, transform_indices = @transform_4, window_bounds = array<i64: 1, 128>}, {pipeline_mode = #tpu.pipeline_mode<synchronous>, transform_indices = @transform_5, window_bounds = array<i64: 128, 128>}, {pipeline_mode = #tpu.pipeline_mode<synchronous>, transform_indices = @transform_6, window_bounds = array<i64: 1, 128>}, {transform_indices = @transform_7, window_bounds = array<i64: 256, 128>}]} {
    %c0 = arith.constant 0 : index
    %c0_0 = arith.constant 0 : index
    %0 = vector.load %arg1[%c0, %c0_0] : memref<256x256xbf16, #tpu.memory_space<vmem>>, vector<256x256xbf16>
    %c0_1 = arith.constant 0 : index
    %c0_2 = arith.constant 0 : index
    %1 = vector.load %arg2[%c0_1, %c0_2] : memref<256x128xbf16, #tpu.memory_space<vmem>>, vector<256x128xbf16>
    %cst = arith.constant dense<0.000000e+00> : vector<256x128xf32>
    %2 = tpu.matmul %0, %1, %cst {dimension_numbers = #tpu.dot_dimension_numbers<[1], [0], [0], [1], [0, 0, 1, 1], [], []>} : vector<256x256xbf16>, vector<256x128xbf16>, vector<256x128xf32> -> vector<256x128xf32>
    %c0_3 = arith.constant 0 : index
    %c0_4 = arith.constant 0 : index
    %3 = vector.load %arg3[%c0_3, %c0_4] : memref<256x128xf32, #tpu.memory_space<vmem>>, vector<256x128xf32>
    %4 = arith.addf %2, %3 : vector<256x128xf32>
    %c0_5 = arith.constant 0 : index
    %c0_6 = arith.constant 0 : index
    %5 = vector.load %arg4[%c0_5, %c0_6] : memref<128x128xf32, #tpu.memory_space<vmem>>, vector<128x128xf32>
    %cst_7 = arith.constant dense<0.000000e+00> : vector<256x128xf32>
    %6 = tpu.matmul %4, %5, %cst_7 {dimension_numbers = #tpu.dot_dimension_numbers<[1], [0], [0], [1], [0, 0, 1, 1], [], []>} : vector<256x128xf32>, vector<128x128xf32>, vector<256x128xf32> -> vector<256x128xf32>
    %c0_8 = arith.constant 0 : index
    %c0_9 = arith.constant 0 : index
    %7 = vector.load %arg5[%c0_8, %c0_9] : memref<1x128xf32, #tpu.memory_space<vmem>>, vector<1x128xf32>
    %8 = vector.broadcast %7 : vector<1x128xf32> to vector<256x128xf32>
    %9 = arith.addf %6, %8 : vector<256x128xf32>
    %cst_10 = arith.constant 0.000000e+00 : f32
    %10 = vector.broadcast %cst_10 : f32 to vector<256x128xf32>
    %11 = arith.maximumf %9, %10 : vector<256x128xf32>
    %c0_11 = arith.constant 0 : index
    %c0_12 = arith.constant 0 : index
    %12 = vector.load %arg6[%c0_11, %c0_12] : memref<128x128xf32, #tpu.memory_space<vmem>>, vector<128x128xf32>
    %cst_13 = arith.constant dense<0.000000e+00> : vector<256x128xf32>
    %13 = tpu.matmul %11, %12, %cst_13 {dimension_numbers = #tpu.dot_dimension_numbers<[1], [0], [0], [1], [0, 0, 1, 1], [], []>} : vector<256x128xf32>, vector<128x128xf32>, vector<256x128xf32> -> vector<256x128xf32>
    %c0_14 = arith.constant 0 : index
    %c0_15 = arith.constant 0 : index
    %14 = vector.load %arg7[%c0_14, %c0_15] : memref<1x128xf32, #tpu.memory_space<vmem>>, vector<1x128xf32>
    %15 = vector.broadcast %14 : vector<1x128xf32> to vector<256x128xf32>
    %16 = arith.addf %13, %15 : vector<256x128xf32>
    %cst_16 = arith.constant 0.000000e+00 : f32
    %17 = vector.broadcast %cst_16 : f32 to vector<256x128xf32>
    %18 = arith.maximumf %16, %17 : vector<256x128xf32>
    %c0_17 = arith.constant 0 : index
    %c0_18 = arith.constant 0 : index
    %19 = vector.load %arg8[%c0_17, %c0_18] : memref<256x128xf32, #tpu.memory_space<vmem>>, vector<256x128xf32>
    tpu.vector_store %arg8[%c0_17, %c0_18], %18 {strides = array<i32>} : memref<256x128xf32, #tpu.memory_space<vmem>>, vector<256x128xf32>,
    return
  }
  func.func @transform_0(%arg0: i32) -> (i32, i32) {
    %c0_i32 = arith.constant 0 : i32
    %c0_i32_0 = arith.constant 0 : i32
    return %arg0, %c0_i32 : i32, i32
  }
  func.func @transform_1(%arg0: i32) -> (i32, i32) {
    %c0_i32 = arith.constant 0 : i32
    %c0_i32_0 = arith.constant 0 : i32
    %c0_i32_1 = arith.constant 0 : i32
    return %c0_i32, %c0_i32_0 : i32, i32
  }
  func.func @transform_2(%arg0: i32) -> (i32, i32) {
    %c0_i32 = arith.constant 0 : i32
    %c0_i32_0 = arith.constant 0 : i32
    return %arg0, %c0_i32 : i32, i32
  }
  func.func @transform_3(%arg0: i32) -> (i32, i32) {
    %c0_i32 = arith.constant 0 : i32
    %c0_i32_0 = arith.constant 0 : i32
    %c0_i32_1 = arith.constant 0 : i32
    return %c0_i32, %c0_i32_0 : i32, i32
  }
  func.func @transform_4(%arg0: i32) -> (i32, i32) {
    %c0_i32 = arith.constant 0 : i32
    %c0_i32_0 = arith.constant 0 : i32
    %c0_i32_1 = arith.constant 0 : i32
    return %c0_i32, %c0_i32_0 : i32, i32
  }
  func.func @transform_5(%arg0: i32) -> (i32, i32) {
    %c0_i32 = arith.constant 0 : i32
    %c0_i32_0 = arith.constant 0 : i32
    %c0_i32_1 = arith.constant 0 : i32
    return %c0_i32, %c0_i32_0 : i32, i32
  }
  func.func @transform_6(%arg0: i32) -> (i32, i32) {
    %c0_i32 = arith.constant 0 : i32
    %c0_i32_0 = arith.constant 0 : i32
    %c0_i32_1 = arith.constant 0 : i32
    return %c0_i32, %c0_i32_0 : i32, i32
  }
  func.func @transform_7(%arg0: i32) -> (i32, i32) {
    %c0_i32 = arith.constant 0 : i32
    %c0_i32_0 = arith.constant 0 : i32
    return %arg0, %c0_i32 : i32, i32
  }
}

</mosaic_0001>

<bundles_post_ra>
// kernel: tpu_custom_call.1
= control target key start
LH: loop header
LB: loop body
LE: loop exit
PB: predicated region body
PF: predicated region fallthrough
CT: control target
= control target key end

     0   :  { %12 = vsyncpa [#allocation3], 0  ;;  %s2127_s0 = inlined_call_operand.hbm [shape: bf16[256,256], index: 0, kind: input, shape index: {}]   ;;  %s2128_s1 = inlined_call_operand.hbm [shape: bf16[256,128], index: 1, kind: input, shape index: {}]   ;;  %s2129_s2 = inlined_call_operand.hbm [shape: f32[256,128], index: 2, kind: input, shape index: {}]   ;;  %s2130_s3 = inlined_call_operand.hbm [shape: f32[128,128], index: 3, kind: input, shape index: {}]   ;;  %s2131_s4 = inlined_call_operand.vmem [shape: f32[1,128], index: 4, kind: input, shape index: {}]   ;;  %s2132_s5 = inlined_call_operand.hbm [shape: f32[128,128], index: 5, kind: input, shape index: {}]   ;;  %s2133_s6 = inlined_call_operand.vmem [shape: f32[1,128], index: 6, kind: input, shape index: {}]   ;;  %s2134_s7 = inlined_call_operand.hbm [shape: f32[256,128], index: 7, kind: output, shape index: {}]  }
   0x1   :  { %13 = vsyncpa [#allocation6], 0 }
   0x2   :  { %14 = vsyncpa [#allocation9], 0 }
   0x3   :  { %15 = vsyncpa [#allocation4], 0  ;;  %s1916_s24 = smov [#allocation5]   ;;  %s1776_s28 = scalar_lea.hbm %s2128_s1, 2048 }
   0x4   :  { %s33_s25 = sshll.u32 %s1916_s24, 4  ;;  %p1777_p0 = scmp.ne.s32.totalorder %s2128_s1, %s1776_s28  ;;  %s34_s25 = int_to_ptr.vmem [resolvable:$true] %s33_s25 }
   0x5   :  { %p1780_p1 = scmp.lt.u32.totalorder %s1776_s28, %s2128_s1 }
   0x7   :  { %p1782_p2 = pnand %p1780_p1, %p1777_p0 }
   0x9   :  { %1785 = shalt.err (!%p1782_p2)
}
   0xa   :  { %s1786_s10 = scalar_lea.vmem %s34_s25, 2048  ;;  %p1791_p4 = scmp.lt.s32.totalorder %s34_s25, %s34_s25 }
   0xb   :  { %p1787_p3 = scmp.ne.s32.totalorder %s34_s25, %s1786_s10  ;;  %p1792_p5 = scmp.lt.s32.totalorder %s1786_s10, %s1786_s10 }
   0xd   :  { %p1793_p6 = por %p1792_p5, %p1791_p4 }
   0xf   :  { %p1794_p7 = pnand %p1793_p6, %p1787_p3 }
  0x11   :  { %1797 = shalt.err (!%p1794_p7)
}
  0x12   :  { %s1917_s11 = smov 64   ;;  %s1918_s12 = smov 4  }
  0x13   :  { %39 = dma.hbm_to_vmem [thread:$0]  %s2128_s1, 2048, %s34_s25, [#allocation6], %s1917_s11, %s1917_s11, %s1918_s12  }
  0x14   :  { %s1919_s15 = smov [#allocation8]   ;;  %s1920_s17 = smov [#allocation2]  }
  0x15   :  { %s57_s16 = sshll.u32 %s1919_s15, 4  ;;  %s21_s18 = sshll.u32 %s1920_s17, 4  ;;  %s58_s16 = int_to_ptr.vmem [resolvable:$true] %s57_s16  ;;  %s22_s18 = int_to_ptr.vmem [resolvable:$true] %s21_s18 }
  0x16   :  { %s1798_s21 = scalar_lea.hbm %s2130_s3, 2048 }
  0x17   :  { %p1799_p8 = scmp.ne.s32.totalorder %s2130_s3, %s1798_s21  ;;  %p1802_p9 = scmp.lt.u32.totalorder %s1798_s21, %s2130_s3 }
  0x19   :  { %p1804_p10 = pnand %p1802_p9, %p1799_p8 }
  0x1b   :  { %1807 = shalt.err (!%p1804_p10)
}
  0x1c   :  { %s1808_s1 = scalar_lea.vmem %s58_s16, 2048  ;;  %p1813_p12 = scmp.lt.s32.totalorder %s58_s16, %s58_s16 }
  0x1d   :  { %p1809_p11 = scmp.ne.s32.totalorder %s58_s16, %s1808_s1  ;;  %p1814_p13 = scmp.lt.s32.totalorder %s1808_s1, %s1808_s1 }
  0x1f   :  { %p1815_p0 = por %p1814_p13, %p1813_p12 }
  0x21   :  { %p1816_p1 = pnand %p1815_p0, %p1809_p11 }
  0x23   :  { %1819 = shalt.err (!%p1816_p1)
}
  0x24   :  { %s1921_s25 = smov 128   ;;  %s1922_s27 = smov 8  }
  0x25   :  { %63 = dma.hbm_to_vmem [thread:$0]  %s2130_s3, 2048, %s58_s16, [#allocation9], %s1921_s25, %s1921_s25, %s1922_s27  }
  0x26   :  { %s1820_s9 = scalar_lea.hbm %s2127_s0, 4096 }
  0x27   :  { %p1821_p2 = scmp.ne.s32.totalorder %s2127_s0, %s1820_s9  ;;  %p1824_p3 = scmp.lt.u32.totalorder %s1820_s9, %s2127_s0 }
  0x29   :  { %p1826_p4 = pnand %p1824_p3, %p1821_p2 }
  0x2b   :  { %1829 = shalt.err (!%p1826_p4)
}
  0x2c   :  { %s1830_s14 = scalar_lea.vmem %s22_s18, 4096  ;;  %p1835_p6 = scmp.lt.s32.totalorder %s22_s18, %s22_s18 }
  0x2d   :  { %p1831_p5 = scmp.ne.s32.totalorder %s22_s18, %s1830_s14  ;;  %p1836_p7 = scmp.lt.s32.totalorder %s1830_s14, %s1830_s14 }
  0x2f   :  { %p1837_p8 = por %p1836_p7, %p1835_p6 }
  0x31   :  { %p1838_p9 = pnand %p1837_p8, %p1831_p5 }
  0x33   :  { %1841 = shalt.err (!%p1838_p9)
}
  0x34   :  { %27 = dma.hbm_to_vmem [thread:$0]  %s2127_s0, 4096, %s22_s18, [#allocation3], %s1921_s25, %s1921_s25, %s1922_s27  }
  0x35   :  { %s1923_s16 = smov [#allocation7]   ;;  %s1924_s19 = smov [#allocation10]  }
  0x36   :  { %s45_s17 = sshll.u32 %s1923_s16, 4  ;;  %s71_s20 = sshll.u32 %s1924_s19, 4  ;;  %s46_s17 = int_to_ptr.vmem [resolvable:$true] %s45_s17  ;;  %s72_s20 = int_to_ptr.vmem [resolvable:$true] %s71_s20 }
  0x37   :  { %s1842_s23 = scalar_lea.hbm %s2129_s2, 4096 }
  0x38   :  { %p1843_p10 = scmp.ne.s32.totalorder %s2129_s2, %s1842_s23  ;;  %p1846_p11 = scmp.lt.u32.totalorder %s1842_s23, %s2129_s2 }
  0x3a   :  { %p1848_p12 = pnand %p1846_p11, %p1843_p10 }
  0x3c   :  { %1851 = shalt.err (!%p1848_p12)
}
  0x3d   :  { %s1852_s0 = scalar_lea.vmem %s46_s17, 4096  ;;  %p1857_p0 = scmp.lt.s32.totalorder %s46_s17, %s46_s17 }
  0x3e   :  { %p1853_p13 = scmp.ne.s32.totalorder %s46_s17, %s1852_s0  ;;  %p1858_p1 = scmp.lt.s32.totalorder %s1852_s0, %s1852_s0 }
  0x40   :  { %p1859_p2 = por %p1858_p1, %p1857_p0 }
  0x42   :  { %p1860_p3 = pnand %p1859_p2, %p1853_p13 }
  0x44   :  { %1863 = shalt.err (!%p1860_p3)
}
  0x45   :  { %51 = dma.hbm_to_vmem [thread:$0]  %s2129_s2, 4096, %s46_s17, [#allocation6], %s1921_s25, %s1921_s25, %s1922_s27  }
  0x46   :  { %s1864_s9 = scalar_lea.hbm %s2132_s5, 2048 }
  0x47   :  { %p1865_p4 = scmp.ne.s32.totalorder %s2132_s5, %s1864_s9  ;;  %p1868_p5 = scmp.lt.u32.totalorder %s1864_s9, %s2132_s5 }
  0x49   :  { %p1870_p6 = pnand %p1868_p5, %p1865_p4 }
  0x4b   :  { %1873 = shalt.err (!%p1870_p6)
}
  0x4c   :  { %s1874_s14 = scalar_lea.vmem %s72_s20, 2048  ;;  %p1879_p8 = scmp.lt.s32.totalorder %s72_s20, %s72_s20 }
  0x4d   :  { %p1875_p7 = scmp.ne.s32.totalorder %s72_s20, %s1874_s14  ;;  %p1880_p9 = scmp.lt.s32.totalorder %s1874_s14, %s1874_s14 }
  0x4f   :  { %p1881_p10 = por %p1880_p9, %p1879_p8 }
  0x51   :  { %p1882_p11 = pnand %p1881_p10, %p1875_p7 }
  0x53   :  { %1885 = shalt.err (!%p1882_p11)
}
  0x54   :  { %77 = dma.hbm_to_vmem [thread:$0]  %s2132_s5, 2048, %s72_s20, [#allocation9], %s1921_s25, %s1921_s25, %s1922_s27  }
  0x55   :  { %1908 = dma.done.wait [#allocation3], 4096  }
  0x56   :  { %1909 = vsyncadd [#allocation3], 4294963200 }
  0x57   :  { %1910 = dma.done.wait [#allocation6], 6144  }
  0x58   :  { %1911 = vsyncadd [#allocation6], 4294961152 }
  0x59   :  { %1912 = dma.done.wait [#allocation9], 4096  }
  0x5a   :  { %1913 = vsyncadd [#allocation9], 4294963200  ;;  %v1712_v0 = vld [vmem:[#allocation5 + $0x40] sm:$0xff]   ;;  %v1714_v2 = vld [vmem:[#allocation5 + $0x48] sm:$0xff]  }
  0x5b   :  { %v1713_v1 = vld [vmem:[#allocation5] sm:$0xff]   ;;  %1270 = vmatprep.subr.bf16.mxu0 %v1712_v0  ;;  %v1715_v3 = vld [vmem:[#allocation5 + $0x8] sm:$0xff]   ;;  %v1716_v4 = vld [vmem:[#allocation5 + $0x50] sm:$0xff]  }
  0x5c   :  { %1271 = vmatpush3.bf16.msra.mxu0 %v1713_v1  ;;  %v1717_v5 = vld [vmem:[#allocation5 + $0x10] sm:$0xff]   ;;  %v1718_v6 = vld [vmem:[#allocation5 + $0x58] sm:$0xff]   ;;  %v1720_v8 = vld [vmem:[#allocation5 + $0x60] sm:$0xff]  }
  0x5d   :  { %1272 = vmatprep.subr.bf16.mxu0 %v1714_v2  ;;  %v1719_v7 = vld [vmem:[#allocation5 + $0x18] sm:$0xff]   ;;  %v1721_v9 = vld [vmem:[#allocation5 + $0x20] sm:$0xff]   ;;  %v1722_v10 = vld [vmem:[#allocation5 + $0x68] sm:$0xff]  }
  0x5e   :  { %v1730_v11 = vld [vmem:[#allocation2 + $0x4] ss:$8 sps:$4 sm:$0xff]   ;;  %v1724_v13 = vld [vmem:[#allocation5 + $0x70] sm:$0xff]   ;;  %v1726_v15 = vld [vmem:[#allocation5 + $0x78] sm:$0xff]  }
  0x5f   :  { %v1723_v12 = vld [vmem:[#allocation5 + $0x28] sm:$0xff]   ;;  %480 = vmatprep.mubr.bf16.mxu0 %v1730_v11  ;;  %v1725_v14 = vld [vmem:[#allocation5 + $0x30] sm:$0xff]   ;;  %v1727_v16 = vld [vmem:[#allocation5 + $0x38] sm:$0xff]  }
  0x60   :  { %1273 = vmatpush3.bf16.msra.mxu0 %v1715_v3  ;;  %v1728_v17 = vld [vmem:[#allocation2] ss:$8 sps:$4 sm:$0xff]   ;;  %v1731_v18 = vld [vmem:[#allocation2 + $0x14] ss:$8 sps:$4 sm:$0xff]   ;;  %v1733_v21 = vld [vmem:[#allocation2 + $0x10] ss:$8 sps:$4 sm:$0xff]  }
  0x61   :  { %1274 = vmatprep.subr.bf16.mxu0 %v1716_v4  ;;  %v609_v19 = vld [vmem:[#allocation8] sm:$0xff]  ;;  %v610_v20 = vld [vmem:[#allocation8 + $0x8] sm:$0xff]  ;;  %v611_v23 = vld [vmem:[#allocation8 + $0x10] sm:$0xff] }
  0x62   :  { %v1638_v22 = vpack.c.bf16 %v610_v20, %v609_v19  ;;  %v612_v24 = vld [vmem:[#allocation8 + $0x18] sm:$0xff]  ;;  %v1734_v25 = vld [vmem:[#allocation2 + $0x24] ss:$8 sps:$4 sm:$0xff]   ;;  %v615_v30 = vld [vmem:[#allocation8 + $0x30] sm:$0xff] }
  0x63   :  { %v1642_v26 = vpack.c.bf16 %v612_v24, %v611_v23  ;;  %v613_v27 = vld [vmem:[#allocation8 + $0x20] sm:$0xff]  ;;  %v614_v28 = vld [vmem:[#allocation8 + $0x28] sm:$0xff]  ;;  %v616_v31 = vld [vmem:[#allocation8 + $0x38] sm:$0xff] }
  0x64   :  { %1275 = vmatpush3.bf16.msra.mxu0 %v1717_v5  ;;  %1639 = vmatprep.subr.bf16.mxu1 %v1638_v22  ;;  %v1646_v29 = vpack.c.bf16 %v614_v28, %v613_v27  ;;  %v1736_v32 = vld [vmem:[#allocation2 + $0x20] ss:$8 sps:$4 sm:$0xff]   ;;  %v1650_v33 = vpack.c.bf16 %v616_v31, %v615_v30  ;;  %v1737_v34 = vld [vmem:[#allocation2 + $0x34] ss:$8 sps:$4 sm:$0xff]   ;;  %v1739_v40 = vld [vmem:[#allocation2 + $0x30] ss:$8 sps:$4 sm:$0xff]  }
  0x65   :  { %1276 = vmatprep.subr.bf16.mxu0 %v1718_v6  ;;  %1641 = vmatpush3.bf16.msra.mxu1 %v1638_v22  ;;  %v617_v35 = vld [vmem:[#allocation8 + $0x40] sm:$0xff]  ;;  %v618_v36 = vld [vmem:[#allocation8 + $0x48] sm:$0xff]  ;;  %v619_v38 = vld [vmem:[#allocation8 + $0x50] sm:$0xff] }
  0x66   :  { %1643 = vmatprep.subr.bf16.mxu1 %v1642_v26  ;;  %v1654_v37 = vpack.c.bf16 %v618_v36, %v617_v35  ;;  %v620_v39 = vld [vmem:[#allocation8 + $0x58] sm:$0xff]  ;;  %v1740_v42 = vld [vmem:[#allocation2 + $0x44] ss:$8 sps:$4 sm:$0xff]   ;;  %v1742_v43 = vld [vmem:[#allocation2 + $0x40] ss:$8 sps:$4 sm:$0xff]  }
  0x67   :  { %v1658_v41 = vpack.c.bf16 %v620_v39, %v619_v38  ;;  %v1743_v44 = vld [vmem:[#allocation2 + $0x54] ss:$8 sps:$4 sm:$0xff]   ;;  %v1745_v45 = vld [vmem:[#allocation2 + $0x50] ss:$8 sps:$4 sm:$0xff]   ;;  %v1746_v46 = vld [vmem:[#allocation2 + $0x64] ss:$8 sps:$4 sm:$0xff]  }
  0x68   :  { %1277 = vmatpush3.bf16.msra.mxu0 %v1719_v7  ;;  %v1748_v47 = vld [vmem:[#allocation2 + $0x60] ss:$8 sps:$4 sm:$0xff]   ;;  %v1749_v48 = vld [vmem:[#allocation2 + $0x74] ss:$8 sps:$4 sm:$0xff]   ;;  %v1751_v49 = vld [vmem:[#allocation2 + $0x70] ss:$8 sps:$4 sm:$0xff]  }
  0x69   :  { %1278 = vmatprep.subr.bf16.mxu0 %v1720_v8  ;;  %1645 = vmatpush3.bf16.msra.mxu1 %v1642_v26  ;;  %v1752_v50 = vld [vmem:[#allocation2 + $0x84] ss:$8 sps:$4 sm:$0xff]   ;;  %v1754_v51 = vld [vmem:[#allocation2 + $0x80] ss:$8 sps:$4 sm:$0xff]   ;;  %v1755_v52 = vld [vmem:[#allocation2 + $0x94] ss:$8 sps:$4 sm:$0xff]  }
  0x6a   :  { %1647 = vmatprep.subr.bf16.mxu1 %v1646_v29  ;;  %v1757_v53 = vld [vmem:[#allocation2 + $0x90] ss:$8 sps:$4 sm:$0xff]   ;;  %v1758_v54 = vld [vmem:[#allocation2 + $0xa4] ss:$8 sps:$4 sm:$0xff]   ;;  %v1760_v55 = vld [vmem:[#allocation2 + $0xa0] ss:$8 sps:$4 sm:$0xff]  }
  0x6b   :  { %v1761_v56 = vld [vmem:[#allocation2 + $0xb4] ss:$8 sps:$4 sm:$0xff]   ;;  %v621_v57 = vld [vmem:[#allocation8 + $0x60] sm:$0xff]  ;;  %v622_v58 = vld [vmem:[#allocation8 + $0x68] sm:$0xff] }
  0x6c   :  { %1279 = vmatpush3.bf16.msra.mxu0 %v1721_v9  ;;  %v1662_v59 = vpack.c.bf16 %v622_v58, %v621_v57  ;;  %v1763_v60 = vld [vmem:[#allocation2 + $0xb0] ss:$8 sps:$4 sm:$0xff]   ;;  %v1764_v63 = vld [vmem:[#allocation2 + $0xc4] ss:$8 sps:$4 sm:$0xff]   ;;  %v1766_v1 = vld [vmem:[#allocation2 + $0xc0] ss:$8 sps:$4 sm:$0xff]  }
  0x6d   :  { %1280 = vmatprep.subr.bf16.mxu0 %v1722_v10  ;;  %1649 = vmatpush3.bf16.msra.mxu1 %v1646_v29  ;;  %v623_v61 = vld [vmem:[#allocation8 + $0x70] sm:$0xff]  ;;  %v624_v62 = vld [vmem:[#allocation8 + $0x78] sm:$0xff]  ;;  %v1770_v4 = vld [vmem:[#allocation2 + $0xe4] ss:$8 sps:$4 sm:$0xff]  }
  0x6e   :  { %1651 = vmatprep.subr.bf16.mxu1 %v1650_v33  ;;  %v1666_v0 = vpack.c.bf16 %v624_v62, %v623_v61  ;;  %v1767_v2 = vld [vmem:[#allocation2 + $0xd4] ss:$8 sps:$4 sm:$0xff]   ;;  %v1769_v3 = vld [vmem:[#allocation2 + $0xd0] ss:$8 sps:$4 sm:$0xff]   ;;  %v1772_v5 = vld [vmem:[#allocation2 + $0xe0] ss:$8 sps:$4 sm:$0xff]  }
  0x6f   :  { %v1773_v6 = vld [vmem:[#allocation2 + $0xf4] ss:$8 sps:$4 sm:$0xff]   ;;  %v1775_v7 = vld [vmem:[#allocation2 + $0xf0] ss:$8 sps:$4 sm:$0xff]   ;;  %v889_v9 = vld [vmem:[#allocation10] sm:$0xff] }
  0x70   :  { %1281 = vmatpush3.bf16.msra.mxu0 %v1723_v12  ;;  %v890_v10 = vld [vmem:[#allocation10 + $0x8] sm:$0xff]  ;;  %v160_v12 = vld [vmem:[#allocation7] sm:$0xff]  ;;  %v892_v19 = vld [vmem:[#allocation10 + $0x18] sm:$0xff] }
  0x71   :  { %1282 = vmatprep.subr.bf16.mxu0 %v1724_v13  ;;  %1653 = vmatpush3.bf16.msra.mxu1 %v1650_v33  ;;  %v1670_v13 = vpack.c.bf16 %v890_v10, %v889_v9  ;;  %v893_v24 = vld [vmem:[#allocation10 + $0x20] sm:$0xff]  ;;  %v162_v27 = vld [vmem:[#allocation7 + $0x10] sm:$0xff]  ;;  %v896_v35 = vld [vmem:[#allocation10 + $0x38] sm:$0xff] }
  0x72   :  { %1655 = vmatprep.subr.bf16.mxu1 %v1654_v37  ;;  %v902_v57 = vld [vmem:[#allocation10 + $0x68] sm:$0xff] }
  0x73   :  { %v169_v10 = vld [vmem:[#allocation7 + $0x48] sm:$0xff] }
  0x74   :  { %1283 = vmatpush3.bf16.msra.mxu0 %v1725_v14 }
  0x75   :  { %1284 = vmatprep.subr.bf16.mxu0 %v1726_v15  ;;  %1657 = vmatpush3.bf16.msra.mxu1 %v1654_v37 }
  0x76   :  { %1659 = vmatprep.subr.bf16.mxu1 %v1658_v41 }
  0x78   :  { %1285 = vmatpush3.bf16.msra.mxu0 %v1727_v16  ;;  %v161_v16 = vld [vmem:[#allocation7 + $0x8] sm:$0xff] }
  0x79   :  { %1661 = vmatpush3.bf16.msra.mxu1 %v1658_v41  ;;  %v898_v41 = vld [vmem:[#allocation10 + $0x48] sm:$0xff] }
  0x7a   :  { %1663 = vmatprep.subr.bf16.mxu1 %v1662_v59 }
  0x7b   :  { %481 = vmatmul.mubr.bf16.vlgmr.msra.gmra.mrb[0].mxu0 %v1728_v17 }
  0x7c   :  { %488 = vmatprep.mubr.bf16.mxu0 %v1731_v18  ;;  %v891_v18 = vld [vmem:[#allocation10 + $0x10] sm:$0xff] }
  0x7d   :  { %1665 = vmatpush3.bf16.msra.mxu1 %v1662_v59  ;;  %v1674_v23 = vpack.c.bf16 %v892_v19, %v891_v18  ;;  %v166_v59 = vld [vmem:[#allocation7 + $0x30] sm:$0xff] }
  0x7e   :  { %1667 = vmatprep.subr.bf16.mxu1 %v1666_v0 }
  0x81   :  { %1669 = vmatpush3.bf16.msra.mxu1 %v1666_v0  ;;  %v167_v0 = vld [vmem:[#allocation7 + $0x38] sm:$0xff] }
  0x82   :  { %1671 = vmatprep.subr.bf16.mxu1 %v1670_v13 }
  0x83   :  { %489 = vmatmul.mubr.bf16.gmra.mrb[4].mxu0 %v1733_v21 }
  0x84   :  { %496 = vmatprep.mubr.bf16.mxu0 %v1734_v25  ;;  %v894_v25 = vld [vmem:[#allocation10 + $0x28] sm:$0xff] }
  0x85   :  { %v1678_v31 = vpack.c.bf16 %v894_v25, %v893_v24 }
  0x8b   :  { %497 = vmatmul.mubr.bf16.gmra.mrb[8].mxu0 %v1736_v32  ;;  %v163_v32 = vld [vmem:[#allocation7 + $0x18] sm:$0xff] }
  0x8c   :  { %504 = vmatprep.mubr.bf16.mxu0 %v1737_v34  ;;  %v895_v34 = vld [vmem:[#allocation10 + $0x30] sm:$0xff] }
  0x8d   :  { %v1682_v39 = vpack.c.bf16 %v896_v35, %v895_v34 }
  0x93   :  { %505 = vmatmul.mubr.bf16.gmra.mrb[12].mxu0 %v1739_v40  ;;  %v897_v40 = vld [vmem:[#allocation10 + $0x40] sm:$0xff] }
  0x94   :  { %512 = vmatprep.mubr.bf16.mxu0 %v1740_v42 }
  0x9b   :  { %513 = vmatmul.mubr.bf16.gmra.mrb[16].mxu0 %v1742_v43  ;;  %v164_v43 = vld [vmem:[#allocation7 + $0x20] sm:$0xff] }
  0x9c   :  { %520 = vmatprep.mubr.bf16.mxu0 %v1743_v44 }
  0xa3   :  { %521 = vmatmul.mubr.bf16.gmra.mrb[20].mxu0 %v1745_v45 }
  0xa4   :  { %528 = vmatprep.mubr.bf16.mxu0 %v1746_v46 }
  0xab   :  { %529 = vmatmul.mubr.bf16.gmra.mrb[24].mxu0 %v1748_v47  ;;  %v1686_v47 = vpack.c.bf16 %v898_v41, %v897_v40  ;;  %v175_v40 = vld [vmem:[#allocation7 + $0x78] sm:$0xff] }
  0xac   :  { %536 = vmatprep.mubr.bf16.mxu0 %v1749_v48  ;;  %v165_v48 = vld [vmem:[#allocation7 + $0x28] sm:$0xff] }
  0xb3   :  { %537 = vmatmul.mubr.bf16.gmra.mrb[28].mxu0 %v1751_v49 }
  0xb4   :  { %544 = vmatprep.mubr.bf16.mxu0 %v1752_v50  ;;  %v899_v50 = vld [vmem:[#allocation10 + $0x50] sm:$0xff] }
  0xbb   :  { %545 = vmatmul.mubr.bf16.gmra.mrb[32].mxu0 %v1754_v51  ;;  %v900_v51 = vld [vmem:[#allocation10 + $0x58] sm:$0xff] }
  0xbc   :  { %552 = vmatprep.mubr.bf16.mxu0 %v1755_v52 }
  0xc3   :  { %553 = vmatmul.mubr.bf16.gmra.mrb[36].mxu0 %v1757_v53 }
  0xc4   :  { %560 = vmatprep.mubr.bf16.mxu0 %v1758_v54 }
  0xcb   :  { %561 = vmatmul.mubr.bf16.gmra.mrb[40].mxu0 %v1760_v55  ;;  %v1690_v55 = vpack.c.bf16 %v900_v51, %v899_v50  ;;  %v177_v50 = vld [vmem:[#allocation7 + $0x88] sm:$0xff] }
  0xcc   :  { %568 = vmatprep.mubr.bf16.mxu0 %v1761_v56  ;;  %v901_v56 = vld [vmem:[#allocation10 + $0x60] sm:$0xff] }
  0xd3   :  { %569 = vmatmul.mubr.bf16.gmra.mrb[44].mxu0 %v1763_v60 }
  0xd4   :  { %576 = vmatprep.mubr.bf16.mxu0 %v1764_v63  ;;  %v1694_v63 = vpack.c.bf16 %v902_v57, %v901_v56  ;;  %v178_v56 = vld [vmem:[#allocation7 + $0x90] sm:$0xff] }
  0xdb   :  { %577 = vmatmul.mubr.bf16.gmra.mrb[48].mxu0 %v1766_v1 }
  0xdc   :  { %584 = vmatprep.mubr.bf16.mxu0 %v1767_v2 }
  0xe3   :  { %585 = vmatmul.mubr.bf16.gmra.mrb[52].mxu0 %v1769_v3 }
  0xe4   :  { %592 = vmatprep.mubr.bf16.mxu0 %v1770_v4 }
  0xeb   :  { %593 = vmatmul.mubr.bf16.gmra.mrb[56].mxu0 %v1772_v5 }
  0xec   :  { %600 = vmatprep.mubr.bf16.mxu0 %v1773_v6  ;;  %v168_v6 = vld [vmem:[#allocation7 + $0x40] sm:$0xff] }
  0xf3   :  { %601 = vmatmul.mubr.bf16.gmra.mrb[60].mxu0 %v1775_v7 }
 0x14e   :  { %v1286_v8 = vpop.f32.mrb[0].mxu0 }
 0x14f   :  { %v1287_v11 = vpop.f32.mrb[1].mxu0 }
 0x150   :  { %v1288_v14 = vadd.f32 %v1287_v11, %v1286_v8  ;;  %v1289_v15 = vpop.f32.mrb[2].mxu0 }
 0x151   :  { %v1290_v17 = vpop.f32.mrb[3].mxu0 }
 0x152   :  { %v1291_v20 = vadd.f32 %v1290_v17, %v1289_v15  ;;  %v483_v21 = vadd.f32 %v1288_v14, %v160_v12 }
 0x154   :  { %v486_v22 = vadd.f32 %v1291_v20, %v161_v16  ;;  %1510 = vmatprep.mubr.f32.mxu1 %v483_v21  ;;  %v170_v16 = vld [vmem:[#allocation7 + $0x50] sm:$0xff]  ;;  %v171_v20 = vld [vmem:[#allocation7 + $0x58] sm:$0xff] }
 0x156   :  { %v1292_v26 = vpop.f32.mrb[4].mxu0  ;;  %1511 = vmatmul.mubr.f32.vlgmr.msra.gmra.mrb[0].mxu1 %v486_v22 }
 0x157   :  { %v1293_v28 = vpop.f32.mrb[5].mxu0  ;;  %1673 = vmatpush3.bf16.msra.mxu1 %v1670_v13 }
 0x158   :  { %v1294_v29 = vadd.f32 %v1293_v28, %v1292_v26  ;;  %v1295_v30 = vpop.f32.mrb[6].mxu0  ;;  %1675 = vmatprep.subr.bf16.mxu1 %v1674_v23  ;;  %v172_v26 = vld [vmem:[#allocation7 + $0x60] sm:$0xff] }
 0x159   :  { %v1296_v33 = vpop.f32.mrb[7].mxu0 }
 0x15a   :  { %v491_v36 = vadd.f32 %v1294_v29, %v162_v27  ;;  %v1297_v37 = vadd.f32 %v1296_v33, %v1295_v30  ;;  %v173_v30 = vld [vmem:[#allocation7 + $0x68] sm:$0xff] }
 0x15b   :  { %1677 = vmatpush3.bf16.msra.mxu1 %v1674_v23 }
 0x15c   :  { %v494_v38 = vadd.f32 %v1297_v37, %v163_v32  ;;  %1513 = vmatprep.mubr.f32.mxu1 %v491_v36  ;;  %1679 = vmatprep.subr.bf16.mxu1 %v1678_v31  ;;  %v174_v36 = vld [vmem:[#allocation7 + $0x70] sm:$0xff] }
 0x15e   :  { %v1298_v42 = vpop.f32.mrb[8].mxu0  ;;  %1514 = vmatmul.mubr.f32.gmra.mrb[2].mxu1 %v494_v38 }
 0x15f   :  { %v1299_v44 = vpop.f32.mrb[9].mxu0  ;;  %1681 = vmatpush3.bf16.msra.mxu1 %v1678_v31 }
 0x160   :  { %v1300_v45 = vadd.f32 %v1299_v44, %v1298_v42  ;;  %v1301_v46 = vpop.f32.mrb[10].mxu0  ;;  %1683 = vmatprep.subr.bf16.mxu1 %v1682_v39 }
 0x161   :  { %v1302_v49 = vpop.f32.mrb[11].mxu0 }
 0x162   :  { %v499_v52 = vadd.f32 %v1300_v45, %v164_v43  ;;  %v1303_v53 = vadd.f32 %v1302_v49, %v1301_v46  ;;  %v176_v46 = vld [vmem:[#allocation7 + $0x80] sm:$0xff] }
 0x163   :  { %1685 = vmatpush3.bf16.msra.mxu1 %v1682_v39 }
 0x164   :  { %v502_v54 = vadd.f32 %v1303_v53, %v165_v48  ;;  %1516 = vmatprep.mubr.f32.mxu1 %v499_v52  ;;  %1687 = vmatprep.subr.bf16.mxu1 %v1686_v47 }
 0x166   :  { %v1304_v58 = vpop.f32.mrb[12].mxu0  ;;  %1517 = vmatmul.mubr.f32.gmra.mrb[4].mxu1 %v502_v54 }
 0x167   :  { %v1305_v60 = vpop.f32.mrb[13].mxu0  ;;  %1689 = vmatpush3.bf16.msra.mxu1 %v1686_v47 }
 0x168   :  { %v1306_v61 = vadd.f32 %v1305_v60, %v1304_v58  ;;  %v1307_v62 = vpop.f32.mrb[14].mxu0  ;;  %1691 = vmatprep.subr.bf16.mxu1 %v1690_v55  ;;  %v179_v60 = vld [vmem:[#allocation7 + $0x98] sm:$0xff] }
 0x169   :  { %v1308_v1 = vpop.f32.mrb[15].mxu0 }
 0x16a   :  { %v507_v2 = vadd.f32 %v1306_v61, %v166_v59  ;;  %v1309_v3 = vadd.f32 %v1308_v1, %v1307_v62 }
 0x16b   :  { %1693 = vmatpush3.bf16.msra.mxu1 %v1690_v55 }
 0x16c   :  { %v510_v4 = vadd.f32 %v1309_v3, %v167_v0  ;;  %1519 = vmatprep.mubr.f32.mxu1 %v507_v2  ;;  %1695 = vmatprep.subr.bf16.mxu1 %v1694_v63  ;;  %v180_v2 = vld [vmem:[#allocation7 + $0xa0] sm:$0xff] }
 0x16e   :  { %v1310_v5 = vpop.f32.mrb[16].mxu0  ;;  %1520 = vmatmul.mubr.f32.gmra.mrb[6].mxu1 %v510_v4 }
 0x16f   :  { %v1311_v7 = vpop.f32.mrb[17].mxu0  ;;  %1697 = vmatpush3.bf16.msra.mxu1 %v1694_v63 }
 0x170   :  { %v1312_v8 = vadd.f32 %v1311_v7, %v1310_v5  ;;  %v1313_v9 = vpop.f32.mrb[18].mxu0 }
 0x171   :  { %v1314_v11 = vpop.f32.mrb[19].mxu0 }
 0x172   :  { %v515_v12 = vadd.f32 %v1312_v8, %v168_v6  ;;  %v1315_v13 = vadd.f32 %v1314_v11, %v1313_v9  ;;  %v181_v6 = vld [vmem:[#allocation7 + $0xa8] sm:$0xff] }
 0x174   :  { %v518_v14 = vadd.f32 %v1315_v13, %v169_v10  ;;  %1522 = vmatprep.mubr.f32.mxu1 %v515_v12  ;;  %v182_v12 = vld [vmem:[#allocation7 + $0xb0] sm:$0xff] }
 0x176   :  { %v1316_v15 = vpop.f32.mrb[20].mxu0  ;;  %1523 = vmatmul.mubr.f32.gmra.mrb[8].mxu1 %v518_v14 }
 0x177   :  { %v1317_v17 = vpop.f32.mrb[21].mxu0 }
 0x178   :  { %v1318_v18 = vadd.f32 %v1317_v17, %v1316_v15  ;;  %v1319_v19 = vpop.f32.mrb[22].mxu0 }
 0x179   :  { %v1320_v21 = vpop.f32.mrb[23].mxu0 }
 0x17a   :  { %v523_v22 = vadd.f32 %v1318_v18, %v170_v16  ;;  %v1321_v23 = vadd.f32 %v1320_v21, %v1319_v19  ;;  %v183_v16 = vld [vmem:[#allocation7 + $0xb8] sm:$0xff]  ;;  %v903_v18 = vld [vmem:[#allocation10 + $0x70] sm:$0xff] }
 0x17b   :  { %v904_v19 = vld [vmem:[#allocation10 + $0x78] sm:$0xff] }
 0x17c   :  { %v526_v24 = vadd.f32 %v1321_v23, %v171_v20  ;;  %1525 = vmatprep.mubr.f32.mxu1 %v523_v22  ;;  %v1698_v22 = vpack.c.bf16 %v904_v19, %v903_v18 }
 0x17e   :  { %v1322_v25 = vpop.f32.mrb[24].mxu0  ;;  %1526 = vmatmul.mubr.f32.gmra.mrb[10].mxu1 %v526_v24  ;;  %1699 = vmatprep.subr.bf16.mxu1 %v1698_v22 }
 0x17f   :  { %v1323_v27 = vpop.f32.mrb[25].mxu0  ;;  %1701 = vmatpush3.bf16.msra.mxu1 %v1698_v22 }
 0x180   :  { %v1324_v28 = vadd.f32 %v1323_v27, %v1322_v25  ;;  %v1325_v29 = vpop.f32.mrb[26].mxu0  ;;  %v184_v25 = vld [vmem:[#allocation7 + $0xc0] sm:$0xff] }
 0x181   :  { %v1326_v31 = vpop.f32.mrb[27].mxu0 }
 0x182   :  { %v531_v32 = vadd.f32 %v1324_v28, %v172_v26  ;;  %v1327_v33 = vadd.f32 %v1326_v31, %v1325_v29  ;;  %v185_v29 = vld [vmem:[#allocation7 + $0xc8] sm:$0xff] }
 0x184   :  { %v534_v34 = vadd.f32 %v1327_v33, %v173_v30  ;;  %1528 = vmatprep.mubr.f32.mxu1 %v531_v32 }
 0x186   :  { %v1328_v35 = vpop.f32.mrb[28].mxu0  ;;  %1529 = vmatmul.mubr.f32.gmra.mrb[12].mxu1 %v534_v34 }
 0x187   :  { %v1329_v37 = vpop.f32.mrb[29].mxu0 }
 0x188   :  { %v1330_v38 = vadd.f32 %v1329_v37, %v1328_v35  ;;  %v1331_v39 = vpop.f32.mrb[30].mxu0  ;;  %v186_v35 = vld [vmem:[#allocation7 + $0xd0] sm:$0xff] }
 0x189   :  { %v1332_v41 = vpop.f32.mrb[31].mxu0 }
 0x18a   :  { %v539_v42 = vadd.f32 %v1330_v38, %v174_v36  ;;  %v1333_v43 = vadd.f32 %v1332_v41, %v1331_v39  ;;  %v187_v39 = vld [vmem:[#allocation7 + $0xd8] sm:$0xff] }
 0x18c   :  { %v542_v44 = vadd.f32 %v1333_v43, %v175_v40  ;;  %1531 = vmatprep.mubr.f32.mxu1 %v539_v42 }
 0x18e   :  { %v1334_v45 = vpop.f32.mrb[32].mxu0  ;;  %1532 = vmatmul.mubr.f32.gmra.mrb[14].mxu1 %v542_v44 }
 0x18f   :  { %v1335_v47 = vpop.f32.mrb[33].mxu0 }
 0x190   :  { %v1336_v48 = vadd.f32 %v1335_v47, %v1334_v45  ;;  %v1337_v49 = vpop.f32.mrb[34].mxu0  ;;  %v188_v45 = vld [vmem:[#allocation7 + $0xe0] sm:$0xff] }
 0x191   :  { %v1338_v51 = vpop.f32.mrb[35].mxu0 }
 0x192   :  { %v547_v52 = vadd.f32 %v1336_v48, %v176_v46  ;;  %v1339_v53 = vadd.f32 %v1338_v51, %v1337_v49  ;;  %v189_v49 = vld [vmem:[#allocation7 + $0xe8] sm:$0xff] }
 0x194   :  { %v550_v54 = vadd.f32 %v1339_v53, %v177_v50  ;;  %1534 = vmatprep.mubr.f32.mxu1 %v547_v52 }
 0x196   :  { %v1340_v55 = vpop.f32.mrb[36].mxu0  ;;  %1535 = vmatmul.mubr.f32.gmra.mrb[16].mxu1 %v550_v54 }
 0x197   :  { %v1341_v57 = vpop.f32.mrb[37].mxu0 }
 0x198   :  { %v1342_v58 = vadd.f32 %v1341_v57, %v1340_v55  ;;  %v1343_v59 = vpop.f32.mrb[38].mxu0  ;;  %v190_v55 = vld [vmem:[#allocation7 + $0xf0] sm:$0xff] }
 0x199   :  { %v1344_v61 = vpop.f32.mrb[39].mxu0 }
 0x19a   :  { %v555_v62 = vadd.f32 %v1342_v58, %v178_v56  ;;  %v1345_v63 = vadd.f32 %v1344_v61, %v1343_v59  ;;  %v191_v59 = vld [vmem:[#allocation7 + $0xf8] sm:$0xff] }
 0x19c   :  { %v558_v0 = vadd.f32 %v1345_v63, %v179_v60  ;;  %1537 = vmatprep.mubr.f32.mxu1 %v555_v62 }
 0x19e   :  { %v1346_v1 = vpop.f32.mrb[40].mxu0  ;;  %1538 = vmatmul.mubr.f32.gmra.mrb[18].mxu1 %v558_v0  ;;  %v2041_v0 = vld [vmem:[%s2131_s4] ss:$0 sm:$0xff] }
 0x19f   :  { %v1347_v3 = vpop.f32.mrb[41].mxu0 }
 0x1a0   :  { %v1348_v4 = vadd.f32 %v1347_v3, %v1346_v1  ;;  %v1349_v5 = vpop.f32.mrb[42].mxu0 }
 0x1a1   :  { %v1350_v7 = vpop.f32.mrb[43].mxu0 }
 0x1a2   :  { %v563_v8 = vadd.f32 %v1348_v4, %v180_v2  ;;  %v1351_v9 = vadd.f32 %v1350_v7, %v1349_v5 }
 0x1a4   :  { %v566_v10 = vadd.f32 %v1351_v9, %v181_v6  ;;  %1540 = vmatprep.mubr.f32.mxu1 %v563_v8 }
 0x1a6   :  { %v1352_v11 = vpop.f32.mrb[44].mxu0  ;;  %1541 = vmatmul.mubr.f32.gmra.mrb[20].mxu1 %v566_v10 }
 0x1a7   :  { %v1353_v13 = vpop.f32.mrb[45].mxu0 }
 0x1a8   :  { %v1354_v14 = vadd.f32 %v1353_v13, %v1352_v11  ;;  %v1355_v15 = vpop.f32.mrb[46].mxu0 }
 0x1a9   :  { %v1356_v17 = vpop.f32.mrb[47].mxu0 }
 0x1aa   :  { %v571_v20 = vadd.f32 %v1354_v14, %v182_v12  ;;  %v1357_v21 = vadd.f32 %v1356_v17, %v1355_v15 }
 0x1ac   :  { %v574_v23 = vadd.f32 %v1357_v21, %v183_v16  ;;  %1543 = vmatprep.mubr.f32.mxu1 %v571_v20 }
 0x1ae   :  { %v1358_v24 = vpop.f32.mrb[48].mxu0  ;;  %1544 = vmatmul.mubr.f32.gmra.mrb[22].mxu1 %v574_v23 }
 0x1af   :  { %v1359_v26 = vpop.f32.mrb[49].mxu0 }
 0x1b0   :  { %v1360_v27 = vadd.f32 %v1359_v26, %v1358_v24  ;;  %v1361_v28 = vpop.f32.mrb[50].mxu0 }
 0x1b1   :  { %v1362_v30 = vpop.f32.mrb[51].mxu0 }
 0x1b2   :  { %v579_v31 = vadd.f32 %v1360_v27, %v184_v25  ;;  %v1363_v32 = vadd.f32 %v1362_v30, %v1361_v28 }
 0x1b4   :  { %v582_v33 = vadd.f32 %v1363_v32, %v185_v29  ;;  %1546 = vmatprep.mubr.f32.mxu1 %v579_v31 }
 0x1b6   :  { %v1364_v34 = vpop.f32.mrb[52].mxu0  ;;  %1547 = vmatmul.mubr.f32.gmra.mrb[24].mxu1 %v582_v33 }
 0x1b7   :  { %v1365_v36 = vpop.f32.mrb[53].mxu0 }
 0x1b8   :  { %v1366_v37 = vadd.f32 %v1365_v36, %v1364_v34  ;;  %v1367_v38 = vpop.f32.mrb[54].mxu0 }
 0x1b9   :  { %v1368_v40 = vpop.f32.mrb[55].mxu0 }
 0x1ba   :  { %v587_v41 = vadd.f32 %v1366_v37, %v186_v35  ;;  %v1369_v42 = vadd.f32 %v1368_v40, %v1367_v38 }
 0x1bc   :  { %v590_v43 = vadd.f32 %v1369_v42, %v187_v39  ;;  %1549 = vmatprep.mubr.f32.mxu1 %v587_v41 }
 0x1be   :  { %v1370_v44 = vpop.f32.mrb[56].mxu0  ;;  %1550 = vmatmul.mubr.f32.gmra.mrb[26].mxu1 %v590_v43 }
 0x1bf   :  { %v1371_v46 = vpop.f32.mrb[57].mxu0 }
 0x1c0   :  { %v1372_v47 = vadd.f32 %v1371_v46, %v1370_v44  ;;  %v1373_v48 = vpop.f32.mrb[58].mxu0 }
 0x1c1   :  { %v1374_v50 = vpop.f32.mrb[59].mxu0 }
 0x1c2   :  { %v595_v51 = vadd.f32 %v1372_v47, %v188_v45  ;;  %v1375_v52 = vadd.f32 %v1374_v50, %v1373_v48 }
 0x1c4   :  { %v598_v53 = vadd.f32 %v1375_v52, %v189_v49  ;;  %1552 = vmatprep.mubr.f32.mxu1 %v595_v51 }
 0x1c6   :  { %v1376_v54 = vpop.f32.mrb[60].mxu0  ;;  %1553 = vmatmul.mubr.f32.gmra.mrb[28].mxu1 %v598_v53 }
 0x1c7   :  { %v1377_v56 = vpop.f32.mrb[61].mxu0 }
 0x1c8   :  { %v1378_v57 = vadd.f32 %v1377_v56, %v1376_v54  ;;  %v1379_v58 = vpop.f32.mrb[62].mxu0 }
 0x1c9   :  { %v1380_v60 = vpop.f32.mrb[63].mxu0 }
 0x1ca   :  { %v603_v61 = vadd.f32 %v1378_v57, %v190_v55  ;;  %v1381_v62 = vadd.f32 %v1380_v60, %v1379_v58 }
 0x1cc   :  { %v606_v63 = vadd.f32 %v1381_v62, %v191_v59  ;;  %1555 = vmatprep.mubr.f32.mxu1 %v603_v61 }
 0x1ce   :  { %1556 = vmatmul.mubr.f32.gmra.mrb[30].mxu1 %v606_v63 }
 0x229   :  { %v1512_v1 = vpop.f32.mrb[0].mxu1 }
 0x22a   :  { %v704_v2 = vadd.f32 %v1512_v1, %v2041_v0  ;;  %v698_v3 = vpop.f32.mrb[1].mxu1 }
 0x22b   :  { %v699_v4 = vadd.f32 %v2041_v0, %v698_v3 }
 0x22c   :  { %v858_v6 = vmax.f32 %v704_v2, 0.0 }
 0x22d   :  { %v857_v5 = vmax.f32 %v699_v4, 0.0 }
 0x22f   :  { %1590 = vmatprep.mubr.f32.mxu1 %v857_v5 }
 0x230   :  { %1591 = vmatmul.mubr.f32.vlgmr.msra.gmra.mrb[32].mxu1 %v858_v6 }
 0x231   :  { %v1515_v7 = vpop.f32.mrb[2].mxu1 }
 0x232   :  { %v714_v8 = vadd.f32 %v1515_v7, %v2041_v0  ;;  %v708_v9 = vpop.f32.mrb[3].mxu1 }
 0x233   :  { %v709_v10 = vadd.f32 %v2041_v0, %v708_v9 }
 0x234   :  { %v860_v12 = vmax.f32 %v714_v8, 0.0 }
 0x235   :  { %v859_v11 = vmax.f32 %v709_v10, 0.0 }
 0x237   :  { %1593 = vmatprep.mubr.f32.mxu1 %v859_v11 }
 0x238   :  { %1594 = vmatmul.mubr.f32.gmra.mrb[34].mxu1 %v860_v12 }
 0x239   :  { %v1518_v13 = vpop.f32.mrb[4].mxu1 }
 0x23a   :  { %v724_v14 = vadd.f32 %v1518_v13, %v2041_v0  ;;  %v718_v15 = vpop.f32.mrb[5].mxu1 }
 0x23b   :  { %v719_v16 = vadd.f32 %v2041_v0, %v718_v15 }
 0x23c   :  { %v862_v18 = vmax.f32 %v724_v14, 0.0 }
 0x23d   :  { %v861_v17 = vmax.f32 %v719_v16, 0.0 }
 0x23f   :  { %1596 = vmatprep.mubr.f32.mxu1 %v861_v17 }
 0x240   :  { %1597 = vmatmul.mubr.f32.gmra.mrb[36].mxu1 %v862_v18 }
 0x241   :  { %v1521_v19 = vpop.f32.mrb[6].mxu1 }
 0x242   :  { %v734_v20 = vadd.f32 %v1521_v19, %v2041_v0  ;;  %v728_v21 = vpop.f32.mrb[7].mxu1 }
 0x243   :  { %v729_v22 = vadd.f32 %v2041_v0, %v728_v21 }
 0x244   :  { %v864_v24 = vmax.f32 %v734_v20, 0.0 }
 0x245   :  { %v863_v23 = vmax.f32 %v729_v22, 0.0 }
 0x247   :  { %1599 = vmatprep.mubr.f32.mxu1 %v863_v23 }
 0x248   :  { %1600 = vmatmul.mubr.f32.gmra.mrb[38].mxu1 %v864_v24 }
 0x249   :  { %v1524_v25 = vpop.f32.mrb[8].mxu1 }
 0x24a   :  { %v744_v26 = vadd.f32 %v1524_v25, %v2041_v0  ;;  %v738_v27 = vpop.f32.mrb[9].mxu1 }
 0x24b   :  { %v739_v28 = vadd.f32 %v2041_v0, %v738_v27 }
 0x24c   :  { %v866_v30 = vmax.f32 %v744_v26, 0.0 }
 0x24d   :  { %v865_v29 = vmax.f32 %v739_v28, 0.0 }
 0x24f   :  { %1602 = vmatprep.mubr.f32.mxu1 %v865_v29 }
 0x250   :  { %1603 = vmatmul.mubr.f32.gmra.mrb[40].mxu1 %v866_v30 }
 0x251   :  { %v1527_v31 = vpop.f32.mrb[10].mxu1 }
 0x252   :  { %v754_v32 = vadd.f32 %v1527_v31, %v2041_v0  ;;  %v748_v33 = vpop.f32.mrb[11].mxu1 }
 0x253   :  { %v749_v34 = vadd.f32 %v2041_v0, %v748_v33 }
 0x254   :  { %v868_v36 = vmax.f32 %v754_v32, 0.0 }
 0x255   :  { %v867_v35 = vmax.f32 %v749_v34, 0.0  ;;  %v2078_v34 = vld [vmem:[%s2133_s6] ss:$0 sm:$0xff]  ;;  %s1925_s6 = smov [#allocation11]  }
 0x256   :  { %s1206_s17 = sshll.u32 %s1925_s6, 4  ;;  %s1207_s17 = int_to_ptr.vmem [resolvable:$true] %s1206_s17 }
 0x257   :  { %1605 = vmatprep.mubr.f32.mxu1 %v867_v35  ;;  %s1886_s19 = scalar_lea.vmem %s1207_s17, 4096  ;;  %p1891_p13 = scmp.lt.s32.totalorder %s1207_s17, %s1207_s17 }
 0x258   :  { %1606 = vmatmul.mubr.f32.gmra.mrb[42].mxu1 %v868_v36  ;;  %p1887_p12 = scmp.ne.s32.totalorder %s1207_s17, %s1886_s19  ;;  %p1892_p0 = scmp.lt.s32.totalorder %s1886_s19, %s1886_s19 }
 0x259   :  { %v1530_v37 = vpop.f32.mrb[12].mxu1 }
 0x25a   :  { %v764_v38 = vadd.f32 %v1530_v37, %v2041_v0  ;;  %v758_v39 = vpop.f32.mrb[13].mxu1  ;;  %p1893_p1 = por %p1892_p0, %p1891_p13 }
 0x25b   :  { %v759_v40 = vadd.f32 %v2041_v0, %v758_v39 }
 0x25c   :  { %v870_v42 = vmax.f32 %v764_v38, 0.0  ;;  %p1894_p2 = pnand %p1893_p1, %p1887_p12 }
 0x25d   :  { %v869_v41 = vmax.f32 %v759_v40, 0.0 }
 0x25f   :  { %1608 = vmatprep.mubr.f32.mxu1 %v869_v41 }
 0x260   :  { %1609 = vmatmul.mubr.f32.gmra.mrb[44].mxu1 %v870_v42 }
 0x261   :  { %v1533_v43 = vpop.f32.mrb[14].mxu1 }
 0x262   :  { %v774_v44 = vadd.f32 %v1533_v43, %v2041_v0  ;;  %v768_v45 = vpop.f32.mrb[15].mxu1 }
 0x263   :  { %v769_v46 = vadd.f32 %v2041_v0, %v768_v45 }
 0x264   :  { %v872_v48 = vmax.f32 %v774_v44, 0.0 }
 0x265   :  { %v871_v47 = vmax.f32 %v769_v46, 0.0 }
 0x267   :  { %1611 = vmatprep.mubr.f32.mxu1 %v871_v47 }
 0x268   :  { %1612 = vmatmul.mubr.f32.gmra.mrb[46].mxu1 %v872_v48 }
 0x269   :  { %v1536_v49 = vpop.f32.mrb[16].mxu1 }
 0x26a   :  { %v784_v50 = vadd.f32 %v1536_v49, %v2041_v0  ;;  %v778_v51 = vpop.f32.mrb[17].mxu1 }
 0x26b   :  { %v779_v52 = vadd.f32 %v2041_v0, %v778_v51 }
 0x26c   :  { %v874_v54 = vmax.f32 %v784_v50, 0.0 }
 0x26d   :  { %v873_v53 = vmax.f32 %v779_v52, 0.0 }
 0x26f   :  { %1614 = vmatprep.mubr.f32.mxu1 %v873_v53 }
 0x270   :  { %1615 = vmatmul.mubr.f32.gmra.mrb[48].mxu1 %v874_v54 }
 0x271   :  { %v1539_v55 = vpop.f32.mrb[18].mxu1 }
 0x272   :  { %v794_v56 = vadd.f32 %v1539_v55, %v2041_v0  ;;  %v788_v57 = vpop.f32.mrb[19].mxu1 }
 0x273   :  { %v789_v58 = vadd.f32 %v2041_v0, %v788_v57 }
 0x274   :  { %v876_v60 = vmax.f32 %v794_v56, 0.0 }
 0x275   :  { %v875_v59 = vmax.f32 %v789_v58, 0.0 }
 0x277   :  { %1617 = vmatprep.mubr.f32.mxu1 %v875_v59 }
 0x278   :  { %1618 = vmatmul.mubr.f32.gmra.mrb[50].mxu1 %v876_v60 }
 0x279   :  { %v1542_v61 = vpop.f32.mrb[20].mxu1 }
 0x27a   :  { %v804_v62 = vadd.f32 %v1542_v61, %v2041_v0  ;;  %v798_v63 = vpop.f32.mrb[21].mxu1 }
 0x27b   :  { %v799_v1 = vadd.f32 %v2041_v0, %v798_v63 }
 0x27c   :  { %v878_v3 = vmax.f32 %v804_v62, 0.0 }
 0x27d   :  { %v877_v2 = vmax.f32 %v799_v1, 0.0 }
 0x27f   :  { %1620 = vmatprep.mubr.f32.mxu1 %v877_v2 }
 0x280   :  { %1621 = vmatmul.mubr.f32.gmra.mrb[52].mxu1 %v878_v3 }
 0x281   :  { %v1545_v4 = vpop.f32.mrb[22].mxu1 }
 0x282   :  { %v814_v5 = vadd.f32 %v1545_v4, %v2041_v0  ;;  %v808_v6 = vpop.f32.mrb[23].mxu1 }
 0x283   :  { %v809_v7 = vadd.f32 %v2041_v0, %v808_v6 }
 0x284   :  { %v880_v9 = vmax.f32 %v814_v5, 0.0 }
 0x285   :  { %v879_v8 = vmax.f32 %v809_v7, 0.0 }
 0x287   :  { %1623 = vmatprep.mubr.f32.mxu1 %v879_v8 }
 0x288   :  { %1624 = vmatmul.mubr.f32.gmra.mrb[54].mxu1 %v880_v9 }
 0x289   :  { %v1548_v10 = vpop.f32.mrb[24].mxu1 }
 0x28a   :  { %v824_v11 = vadd.f32 %v1548_v10, %v2041_v0  ;;  %v818_v12 = vpop.f32.mrb[25].mxu1 }
 0x28b   :  { %v819_v13 = vadd.f32 %v2041_v0, %v818_v12 }
 0x28c   :  { %v882_v15 = vmax.f32 %v824_v11, 0.0 }
 0x28d   :  { %v881_v14 = vmax.f32 %v819_v13, 0.0 }
 0x28f   :  { %1626 = vmatprep.mubr.f32.mxu1 %v881_v14 }
 0x290   :  { %1627 = vmatmul.mubr.f32.gmra.mrb[56].mxu1 %v882_v15 }
 0x291   :  { %v1551_v16 = vpop.f32.mrb[26].mxu1 }
 0x292   :  { %v834_v17 = vadd.f32 %v1551_v16, %v2041_v0  ;;  %v828_v18 = vpop.f32.mrb[27].mxu1 }
 0x293   :  { %v829_v19 = vadd.f32 %v2041_v0, %v828_v18 }
 0x294   :  { %v884_v21 = vmax.f32 %v834_v17, 0.0 }
 0x295   :  { %v883_v20 = vmax.f32 %v829_v19, 0.0 }
 0x297   :  { %1629 = vmatprep.mubr.f32.mxu1 %v883_v20 }
 0x298   :  { %1630 = vmatmul.mubr.f32.gmra.mrb[58].mxu1 %v884_v21 }
 0x299   :  { %v1554_v22 = vpop.f32.mrb[28].mxu1 }
 0x29a   :  { %v844_v23 = vadd.f32 %v1554_v22, %v2041_v0  ;;  %v838_v24 = vpop.f32.mrb[29].mxu1 }
 0x29b   :  { %v839_v25 = vadd.f32 %v2041_v0, %v838_v24 }
 0x29c   :  { %v886_v27 = vmax.f32 %v844_v23, 0.0 }
 0x29d   :  { %v885_v26 = vmax.f32 %v839_v25, 0.0 }
 0x29f   :  { %1632 = vmatprep.mubr.f32.mxu1 %v885_v26 }
 0x2a0   :  { %1633 = vmatmul.mubr.f32.gmra.mrb[60].mxu1 %v886_v27 }
 0x2a1   :  { %v1557_v28 = vpop.f32.mrb[30].mxu1 }
 0x2a2   :  { %v854_v29 = vadd.f32 %v1557_v28, %v2041_v0  ;;  %v848_v30 = vpop.f32.mrb[31].mxu1 }
 0x2a3   :  { %v849_v31 = vadd.f32 %v2041_v0, %v848_v30 }
 0x2a4   :  { %v888_v33 = vmax.f32 %v854_v29, 0.0 }
 0x2a5   :  { %v887_v32 = vmax.f32 %v849_v31, 0.0 }
 0x2a7   :  { %1635 = vmatprep.mubr.f32.mxu1 %v887_v32 }
 0x2a8   :  { %1636 = vmatmul.mubr.f32.gmra.mrb[62].mxu1 %v888_v33 }
 0x303   :  { %v1592_v35 = vpop.f32.mrb[32].mxu1 }
 0x304   :  { %v984_v36 = vadd.f32 %v1592_v35, %v2078_v34  ;;  %v978_v37 = vpop.f32.mrb[33].mxu1 }
 0x305   :  { %v979_v38 = vadd.f32 %v2078_v34, %v978_v37 }
 0x306   :  { %v1138_v39 = vmax.f32 %v984_v36, 0.0 }
 0x307   :  { %v1137_v40 = vmax.f32 %v979_v38, 0.0 }
 0x308   :  { %1170 = vst [vmem:[#allocation11 + $0x8] sm:$0xff] %v1138_v39 }
 0x309   :  { %1169 = vst [vmem:[#allocation11] sm:$0xff] %v1137_v40 }
 0x30b   :  { %v1595_v0 = vpop.f32.mrb[34].mxu1 }
 0x30c   :  { %v994_v41 = vadd.f32 %v1595_v0, %v2078_v34  ;;  %v988_v42 = vpop.f32.mrb[35].mxu1 }
 0x30d   :  { %v989_v43 = vadd.f32 %v2078_v34, %v988_v42 }
 0x30e   :  { %v1140_v44 = vmax.f32 %v994_v41, 0.0 }
 0x30f   :  { %v1139_v45 = vmax.f32 %v989_v43, 0.0 }
 0x310   :  { %1172 = vst [vmem:[#allocation11 + $0x18] sm:$0xff] %v1140_v44 }
 0x311   :  { %1171 = vst [vmem:[#allocation11 + $0x10] sm:$0xff] %v1139_v45 }
 0x313   :  { %v1598_v46 = vpop.f32.mrb[36].mxu1 }
 0x314   :  { %v1004_v47 = vadd.f32 %v1598_v46, %v2078_v34  ;;  %v998_v48 = vpop.f32.mrb[37].mxu1 }
 0x315   :  { %v999_v49 = vadd.f32 %v2078_v34, %v998_v48 }
 0x316   :  { %v1142_v50 = vmax.f32 %v1004_v47, 0.0 }
 0x317   :  { %v1141_v51 = vmax.f32 %v999_v49, 0.0 }
 0x318   :  { %1174 = vst [vmem:[#allocation11 + $0x28] sm:$0xff] %v1142_v50 }
 0x319   :  { %1173 = vst [vmem:[#allocation11 + $0x20] sm:$0xff] %v1141_v51 }
 0x31b   :  { %v1601_v52 = vpop.f32.mrb[38].mxu1 }
 0x31c   :  { %v1014_v53 = vadd.f32 %v1601_v52, %v2078_v34  ;;  %v1008_v54 = vpop.f32.mrb[39].mxu1 }
 0x31d   :  { %v1009_v55 = vadd.f32 %v2078_v34, %v1008_v54 }
 0x31e   :  { %v1144_v56 = vmax.f32 %v1014_v53, 0.0 }
 0x31f   :  { %v1143_v57 = vmax.f32 %v1009_v55, 0.0 }
 0x320   :  { %1176 = vst [vmem:[#allocation11 + $0x38] sm:$0xff] %v1144_v56 }
 0x321   :  { %1175 = vst [vmem:[#allocation11 + $0x30] sm:$0xff] %v1143_v57 }
 0x323   :  { %v1604_v58 = vpop.f32.mrb[40].mxu1 }
 0x324   :  { %v1024_v59 = vadd.f32 %v1604_v58, %v2078_v34  ;;  %v1018_v60 = vpop.f32.mrb[41].mxu1 }
 0x325   :  { %v1019_v61 = vadd.f32 %v2078_v34, %v1018_v60 }
 0x326   :  { %v1146_v62 = vmax.f32 %v1024_v59, 0.0 }
 0x327   :  { %v1145_v63 = vmax.f32 %v1019_v61, 0.0 }
 0x328   :  { %1178 = vst [vmem:[#allocation11 + $0x48] sm:$0xff] %v1146_v62 }
 0x329   :  { %1177 = vst [vmem:[#allocation11 + $0x40] sm:$0xff] %v1145_v63 }
 0x32b   :  { %v1607_v1 = vpop.f32.mrb[42].mxu1 }
 0x32c   :  { %v1034_v2 = vadd.f32 %v1607_v1, %v2078_v34  ;;  %v1028_v3 = vpop.f32.mrb[43].mxu1 }
 0x32d   :  { %v1029_v4 = vadd.f32 %v2078_v34, %v1028_v3 }
 0x32e   :  { %v1148_v5 = vmax.f32 %v1034_v2, 0.0 }
 0x32f   :  { %v1147_v6 = vmax.f32 %v1029_v4, 0.0 }
 0x330   :  { %1180 = vst [vmem:[#allocation11 + $0x58] sm:$0xff] %v1148_v5 }
 0x331   :  { %1179 = vst [vmem:[#allocation11 + $0x50] sm:$0xff] %v1147_v6 }
 0x333   :  { %v1610_v7 = vpop.f32.mrb[44].mxu1 }
 0x334   :  { %v1044_v8 = vadd.f32 %v1610_v7, %v2078_v34  ;;  %v1038_v9 = vpop.f32.mrb[45].mxu1 }
 0x335   :  { %v1039_v10 = vadd.f32 %v2078_v34, %v1038_v9 }
 0x336   :  { %v1150_v11 = vmax.f32 %v1044_v8, 0.0 }
 0x337   :  { %v1149_v12 = vmax.f32 %v1039_v10, 0.0 }
 0x338   :  { %1182 = vst [vmem:[#allocation11 + $0x68] sm:$0xff] %v1150_v11 }
 0x339   :  { %1181 = vst [vmem:[#allocation11 + $0x60] sm:$0xff] %v1149_v12 }
 0x33b   :  { %v1613_v13 = vpop.f32.mrb[46].mxu1 }
 0x33c   :  { %v1054_v14 = vadd.f32 %v1613_v13, %v2078_v34  ;;  %v1048_v15 = vpop.f32.mrb[47].mxu1 }
 0x33d   :  { %v1049_v16 = vadd.f32 %v2078_v34, %v1048_v15 }
 0x33e   :  { %v1152_v17 = vmax.f32 %v1054_v14, 0.0 }
 0x33f   :  { %v1151_v18 = vmax.f32 %v1049_v16, 0.0 }
 0x340   :  { %1184 = vst [vmem:[#allocation11 + $0x78] sm:$0xff] %v1152_v17 }
 0x341   :  { %1183 = vst [vmem:[#allocation11 + $0x70] sm:$0xff] %v1151_v18 }
 0x343   :  { %v1616_v19 = vpop.f32.mrb[48].mxu1 }
 0x344   :  { %v1064_v20 = vadd.f32 %v1616_v19, %v2078_v34  ;;  %v1058_v21 = vpop.f32.mrb[49].mxu1 }
 0x345   :  { %v1059_v22 = vadd.f32 %v2078_v34, %v1058_v21 }
 0x346   :  { %v1154_v23 = vmax.f32 %v1064_v20, 0.0 }
 0x347   :  { %v1153_v24 = vmax.f32 %v1059_v22, 0.0 }
 0x348   :  { %1186 = vst [vmem:[#allocation11 + $0x88] sm:$0xff] %v1154_v23 }
 0x349   :  { %1185 = vst [vmem:[#allocation11 + $0x80] sm:$0xff] %v1153_v24 }
 0x34b   :  { %v1619_v25 = vpop.f32.mrb[50].mxu1 }
 0x34c   :  { %v1074_v26 = vadd.f32 %v1619_v25, %v2078_v34  ;;  %v1068_v27 = vpop.f32.mrb[51].mxu1 }
 0x34d   :  { %v1069_v28 = vadd.f32 %v2078_v34, %v1068_v27 }
 0x34e   :  { %v1156_v29 = vmax.f32 %v1074_v26, 0.0 }
 0x34f   :  { %v1155_v30 = vmax.f32 %v1069_v28, 0.0 }
 0x350   :  { %1188 = vst [vmem:[#allocation11 + $0x98] sm:$0xff] %v1156_v29 }
 0x351   :  { %1187 = vst [vmem:[#allocation11 + $0x90] sm:$0xff] %v1155_v30 }
 0x353   :  { %v1622_v31 = vpop.f32.mrb[52].mxu1 }
 0x354   :  { %v1084_v32 = vadd.f32 %v1622_v31, %v2078_v34  ;;  %v1078_v33 = vpop.f32.mrb[53].mxu1 }
 0x355   :  { %v1079_v35 = vadd.f32 %v2078_v34, %v1078_v33 }
 0x356   :  { %v1158_v36 = vmax.f32 %v1084_v32, 0.0 }
 0x357   :  { %v1157_v37 = vmax.f32 %v1079_v35, 0.0 }
 0x358   :  { %1190 = vst [vmem:[#allocation11 + $0xa8] sm:$0xff] %v1158_v36 }
 0x359   :  { %1189 = vst [vmem:[#allocation11 + $0xa0] sm:$0xff] %v1157_v37 }
 0x35b   :  { %v1625_v38 = vpop.f32.mrb[54].mxu1 }
 0x35c   :  { %v1094_v39 = vadd.f32 %v1625_v38, %v2078_v34  ;;  %v1088_v40 = vpop.f32.mrb[55].mxu1 }
 0x35d   :  { %v1089_v0 = vadd.f32 %v2078_v34, %v1088_v40 }
 0x35e   :  { %v1160_v41 = vmax.f32 %v1094_v39, 0.0 }
 0x35f   :  { %v1159_v42 = vmax.f32 %v1089_v0, 0.0 }
 0x360   :  { %1192 = vst [vmem:[#allocation11 + $0xb8] sm:$0xff] %v1160_v41 }
 0x361   :  { %1191 = vst [vmem:[#allocation11 + $0xb0] sm:$0xff] %v1159_v42 }
 0x363   :  { %v1628_v43 = vpop.f32.mrb[56].mxu1 }
 0x364   :  { %v1104_v44 = vadd.f32 %v1628_v43, %v2078_v34  ;;  %v1098_v45 = vpop.f32.mrb[57].mxu1 }
 0x365   :  { %v1099_v46 = vadd.f32 %v2078_v34, %v1098_v45 }
 0x366   :  { %v1162_v47 = vmax.f32 %v1104_v44, 0.0 }
 0x367   :  { %v1161_v48 = vmax.f32 %v1099_v46, 0.0 }
 0x368   :  { %1194 = vst [vmem:[#allocation11 + $0xc8] sm:$0xff] %v1162_v47 }
 0x369   :  { %1193 = vst [vmem:[#allocation11 + $0xc0] sm:$0xff] %v1161_v48 }
 0x36b   :  { %v1631_v49 = vpop.f32.mrb[58].mxu1 }
 0x36c   :  { %v1114_v50 = vadd.f32 %v1631_v49, %v2078_v34  ;;  %v1108_v51 = vpop.f32.mrb[59].mxu1 }
 0x36d   :  { %v1109_v52 = vadd.f32 %v2078_v34, %v1108_v51 }
 0x36e   :  { %v1164_v53 = vmax.f32 %v1114_v50, 0.0 }
 0x36f   :  { %v1163_v54 = vmax.f32 %v1109_v52, 0.0 }
 0x370   :  { %1196 = vst [vmem:[#allocation11 + $0xd8] sm:$0xff] %v1164_v53 }
 0x371   :  { %1195 = vst [vmem:[#allocation11 + $0xd0] sm:$0xff] %v1163_v54 }
 0x373   :  { %v1634_v55 = vpop.f32.mrb[60].mxu1 }
 0x374   :  { %v1124_v56 = vadd.f32 %v1634_v55, %v2078_v34  ;;  %v1118_v57 = vpop.f32.mrb[61].mxu1 }
 0x375   :  { %v1119_v58 = vadd.f32 %v2078_v34, %v1118_v57 }
 0x376   :  { %v1166_v59 = vmax.f32 %v1124_v56, 0.0 }
 0x377   :  { %v1165_v60 = vmax.f32 %v1119_v58, 0.0 }
 0x378   :  { %1198 = vst [vmem:[#allocation11 + $0xe8] sm:$0xff] %v1166_v59 }
 0x379   :  { %1197 = vst [vmem:[#allocation11 + $0xe0] sm:$0xff] %v1165_v60 }
 0x37b   :  { %v1637_v61 = vpop.f32.mrb[62].mxu1 }
 0x37c   :  { %v1134_v62 = vadd.f32 %v1637_v61, %v2078_v34  ;;  %v1128_v63 = vpop.f32.mrb[63].mxu1 }
 0x37d   :  { %v1129_v1 = vadd.f32 %v2078_v34, %v1128_v63 }
 0x37e   :  { %v1168_v2 = vmax.f32 %v1134_v62, 0.0 }
 0x37f   :  { %v1167_v3 = vmax.f32 %v1129_v1, 0.0 }
 0x380   :  { %1200 = vst [vmem:[#allocation11 + $0xf8] sm:$0xff] %v1168_v2 }
 0x381   :  { %1199 = vst [vmem:[#allocation11 + $0xf0] sm:$0xff] %v1167_v3 }
 0x382   :  { %1897 = shalt.err (!%p1894_p2)
}
 0x383   :  { %s1898_s22 = scalar_lea.hbm %s2134_s7, 4096 }
 0x384   :  { %p1899_p3 = scmp.ne.s32.totalorder %s2134_s7, %s1898_s22  ;;  %p1902_p4 = scmp.lt.u32.totalorder %s1898_s22, %s2134_s7 }
 0x386   :  { %p1904_p5 = pnand %p1902_p4, %p1899_p3 }
 0x388   :  { %1907 = shalt.err (!%p1904_p5)
}
 0x389   :  { %1212 = dma.vmem_to_hbm [thread:$0]  %s1207_s17, 4096, %s2134_s7, [#allocation4], %s1921_s25, %s1921_s25, %s1922_s27  }
 0x38a   :  { %1914 = dma.done.wait [#allocation4], 4096  }
 0x38b   :  { %1915 = vsyncadd [#allocation4], 4294963200 }
 0x38c   :  { %1216 = vsyncpa [#allocation3], 1 }
 0x38d   :  { %1217 = vsyncpa [#allocation6], 1 }
 0x38e   :  { %1218 = vsyncpa [#allocation9], 1 }
 0x38f   :  { %1219 = vsyncpa [#allocation4], 1 }

</bundles_post_ra>
